<compile_context>
chip_gen: v7x
topology: tpu7x:2x2x1
jax: 0.10.0
libtpu: 0.0.40
codegen_flags: <defaults>
</compile_context>

<pallas_src>
import functools

import jax
import jax.numpy as jnp
from jax.experimental import pallas as pl
from jax.experimental.pallas import tpu as pltpu


def _round_up(x, m):
    return ((x + m - 1) // m) * m


def _decoder_kernel(y_ref, table_ref, w_ref, out_ref, *scratch, context_size, bchunk):
    """One batch tile of the stateless decoder.

    y_ref    : (TN, UT)  int32 ids; time axis already left-padded with K-1 ids
               of -1 (the causal zeros) and right-padded with -1 up to UT.
    table_ref: (Vp, Dp)  bf16 embedding table (scale folded in), lane-dense.
    w_ref    : (K, Dp)   f32 depthwise conv taps (weight_scale folded in).
    out_ref  : (TN, Uo, Dp)
    scratch  : [(TN, UT, Dp) f32] embedding staging buffer (only when K > 1).
    """
    TN, UT = y_ref.shape
    Vp, Dp = table_ref.shape
    Uo = out_ref.shape[1]
    K = context_size
    nchunks = TN // bchunk

    vocab_iota = jax.lax.broadcasted_iota(jnp.int32, (1, 1, Vp), 2)

    def embed_chunk(c):
        # One-hot built in VMEM from the raw int32 ids (no HBM inflation) and
        # directly in bf16 (0/1 are exact) -> native bf16 MXU matmul, f32 acc.
        # Rows with id == -1 are all-zero, reproducing
        # `embedding(y.clamp(0)) * (y >= 0)` and the causal left zero-pad.
        n0 = pl.multiple_of(c * bchunk, bchunk)
        ids = y_ref[pl.ds(n0, bchunk), :]                             # (bchunk, UT)
        onehot = (ids[:, :, None] == vocab_iota).astype(jnp.bfloat16)  # (bchunk, UT, Vp)
        emb = jnp.dot(onehot.reshape(bchunk * UT, Vp), table_ref[...],
                      preferred_element_type=jnp.float32)             # (bchunk*UT, Dp)
        return n0, emb.reshape(bchunk, UT, Dp)

    if K > 1:
        (emb_ref,) = scratch

        def body(c, carry):
            n0, emb = embed_chunk(c)
            emb_ref[pl.ds(n0, bchunk), :, :] = emb                    # aligned store
            return carry

        jax.lax.fori_loop(0, nchunks, body, None, unroll=True)

        # Depthwise causal conv: out[:, u, :] = sum_k emb_ext[:, u + k, :] * w[k].
        # All taps read the staging scratch (no extra (TN, Uo, Dp) live temporary
        # beyond the accumulator); one single lane-dense store per block.
        w = w_ref[...]
        acc = emb_ref[:, 0:Uo, :] * w[0][None, None, :]
        for k in range(1, K):
            acc = acc + emb_ref[:, k:k + Uo, :] * w[k][None, None, :]
        out_ref[...] = jnp.maximum(acc, 0.0).astype(out_ref.dtype)
    else:
        # context_size == 1 -> conv is Identity; store relu(emb) chunk by chunk.
        def body(c, carry):
            n0, emb = embed_chunk(c)
            out_ref[pl.ds(n0, bchunk), :, :] = jnp.maximum(
                emb[:, 0:Uo, :], 0.0).astype(out_ref.dtype)
            return carry

        jax.lax.fori_loop(0, nchunks, body, None, unroll=True)


def _pick_batch_tile(N, tn):
    """Sublane-legal batch tile; prefers >= 2 grid steps (v7x has 2 TensorCores)."""
    Npad8 = _round_up(N, 8)
    if Npad8 <= 8:
        # Tiny batch: a single block equal to the (unpadded) batch.
        return N, N
    tn = max(8, _round_up(tn, 8))
    # Cap the tile at ~half the batch so the 'parallel' grid axis has >= 2 steps.
    half = max(8, ((Npad8 // 2) // 8) * 8)
    tn = min(tn, half)
    return tn, _round_up(N, tn)


def _vmem_budget_bytes(tn, UT, Uo, Vp, Dp, K, bchunk, out_itemsize):
    b = Vp * Dp * 2                           # bf16 table, single-buffered
    b += K * Dp * 4                           # conv taps, single-buffered
    b += 2 * tn * UT * 4                      # ids block, double-buffered
    b += 2 * tn * Uo * Dp * out_itemsize      # out block, double-buffered
    if K > 1:
        b += tn * UT * Dp * 4                 # staging scratch
        b += tn * Uo * Dp * 4                 # conv accumulator temp
    b += bchunk * UT * Vp * 2                 # live one-hot chunk (bf16)
    b += bchunk * UT * Dp * 4                 # live emb chunk (f32)
    return b


def decoder_forward(y, emb_table, conv_w_kd, *, context_size, need_pad=True,
                    tn=16, chunk_rows=256, out_dtype=jnp.float32):
    """y: (N, U) int ids.  Returns (N, U, D) in `out_dtype` (default f32)."""
    assert need_pad, "only the need_pad=True training path is implemented"
    N, U = y.shape
    V, D = emb_table.shape
    K = conv_w_kd.shape[0]
    assert K == context_size >= 1

    # Lane-dense padding: vocab and decoder_dim to multiples of 128.
    Vp = _round_up(V, 128)
    Dp = _round_up(D, 128)
    # Sublane-dense time: padded output length and staging length
    # (K-1 causal left pad folded into the ids, then rounded up to 8).
    Uo = _round_up(U, 8)
    UT = _round_up(Uo + K - 1, 8)

    out_itemsize = jnp.dtype(out_dtype).itemsize

    def _bchunk_for(tn_):
        bc = max(1, min(tn_, max(1, chunk_rows // UT)))
        while tn_ % bc:
            bc -= 1
        return bc

    tn_eff, Npad = _pick_batch_tile(N, tn)
    # Shrink the batch tile until the estimate fits comfortably in v7x's 64 MiB.
    while tn_eff > 8 and _vmem_budget_bytes(
            tn_eff, UT, Uo, Vp, Dp, K, _bchunk_for(tn_eff), out_itemsize) > (48 << 20):
        tn_eff = max(8, ((tn_eff // 2) // 8) * 8)
        Npad = _round_up(N, tn_eff)
    bchunk = _bchunk_for(tn_eff)
    budget = _vmem_budget_bytes(tn_eff, UT, Uo, Vp, Dp, K, bchunk, out_itemsize)
    vmem_limit = int(min(max(int(budget * 1.5) + (4 << 20), 32 << 20), 96 << 20))

    # ids: pad batch rows with -1; left-pad time with K-1 blanks (-1 -> zero
    # embedding rows = the causal zero pad), right-pad time with -1 up to UT.
    y_ext = jnp.pad(y.astype(jnp.int32),
                    ((0, Npad - N), (K - 1, UT - (K - 1) - U)),
                    constant_values=-1)
    # bf16 table (one-hot lookup of a bf16 row is exact in f32 accumulation).
    table_pad = jnp.pad(emb_table.astype(jnp.bfloat16), ((0, Vp - V), (0, Dp - D)))
    w_pad = jnp.pad(conv_w_kd.astype(jnp.float32), ((0, 0), (0, Dp - D)))

    grid = (Npad // tn_eff,)
    kernel = functools.partial(_decoder_kernel, context_size=K, bchunk=bchunk)

    scratch_shapes = []
    if K > 1:
        scratch_shapes.append(pltpu.VMEM((tn_eff, UT, Dp), jnp.float32))

    flops = 2 * Npad * UT * Vp * Dp + 2 * Npad * Uo * Dp * K
    bytes_accessed = (Npad * UT * 4 + Vp * Dp * 2 + K * Dp * 4
                      + Npad * Uo * Dp * out_itemsize)

    out = pl.pallas_call(
        kernel,
        out_shape=jax.ShapeDtypeStruct((Npad, Uo, Dp), out_dtype),
        grid=grid,
        in_specs=[
            pl.BlockSpec((tn_eff, UT), lambda n: (n, 0)),          # int32 ids
            pl.BlockSpec((Vp, Dp), lambda n: (0, 0),               # table: grid-
                         pipeline_mode=pl.Buffered(1)),            # invariant, 1 buf
            pl.BlockSpec((K, Dp), lambda n: (0, 0),                # conv taps
                         pipeline_mode=pl.Buffered(1)),
        ],
        out_specs=pl.BlockSpec((tn_eff, Uo, Dp), lambda n: (n, 0, 0)),
        scratch_shapes=scratch_shapes,
        compiler_params=pltpu.CompilerParams(
            dimension_semantics=("parallel",),
            vmem_limit_bytes=vmem_limit,
        ),
        cost_estimate=pl.CostEstimate(
            flops=int(flops), transcendentals=0, bytes_accessed=int(bytes_accessed)
        ),
    )(y_ext, table_pad, w_pad)

    return out[:N, :U, :D]


def init_decoder_params(key, vocab_size, decoder_dim, blank_id, context_size):
    """Deterministic synthetic parameters mirroring the module's __init__ shapes."""
    k_emb, k_conv = jax.random.split(key)

    # ScaledEmbedding: weight (V, D), padding_idx=blank_id row zero, scale folded in.
    emb_weight = jax.random.normal(k_emb, (vocab_size, decoder_dim), jnp.float32) * 0.1
    emb_weight = emb_weight.at[blank_id].set(0.0)
    emb_table = emb_weight * jnp.exp(jnp.float32(0.0))

    # ScaledConv1d: depthwise, weight (D, 1, K), no bias, weight_scale folded in.
    conv_weight = (
        jax.random.normal(k_conv, (decoder_dim, 1, context_size), jnp.float32) * 0.3
    )
    conv_w_kd = jnp.transpose(conv_weight[:, 0, :] * jnp.exp(jnp.float32(0.0)), (1, 0))
    return emb_table, conv_w_kd                                       # (V, D), (K, D)


def decoder_reference(y, emb_table, conv_w_kd, context_size):
    """Pure-JAX reference mirroring the PyTorch forward (need_pad=True)."""
    y = y.astype(jnp.int32)
    emb = emb_table[jnp.clip(y, 0, None)] * (y >= 0)[..., None].astype(jnp.float32)
    if context_size > 1:
        K = context_size
        U = y.shape[1]
        x = jnp.pad(emb, ((0, 0), (K - 1, 0), (0, 0)))                # causal left pad
        out = x[:, 0:U, :] * conv_w_kd[0][None, None, :]
        for k in range(1, K):
            out = out + x[:, k:k + U, :] * conv_w_kd[k][None, None, :]
    else:
        out = emb
    return jnp.maximum(out, 0.0)


if __name__ == "__main__":
    key = jax.random.PRNGKey(0)
    configs = [
        # (vocab, dim, blank, K, N, U, extra kwargs)
        (100, 32, 0, 2, 2, 8, {}),                                    # main path
        (100, 32, 0, 1, 2, 8, {}),                                    # Identity conv
        (300, 96, 0, 3, 20, 13, dict(tn=16, chunk_rows=32)),          # multi-step grid,
                                                                      # odd U, chunked loop
    ]

    for idx, (V, D, blank_id, K, N, U, kwargs) in enumerate(configs):
        key, k_params, k_y = jax.random.split(key, 3)
        emb_table, conv_w_kd = init_decoder_params(k_params, V, D, blank_id, K)
        y = jax.random.randint(k_y, (N, U), 0, V, dtype=jnp.int32)

        out = decoder_forward(y, emb_table, conv_w_kd, context_size=K, **kwargs)
        out = jax.block_until_ready(out)
        assert out.shape == (N, U, D)

        ref_f32 = decoder_reference(y, emb_table, conv_w_kd, K)
        # Same math but with the table pre-rounded to bf16 (what the kernel uses).
        ref_bf16tab = decoder_reference(
            y, emb_table.astype(jnp.bfloat16).astype(jnp.float32), conv_w_kd, K)

        assert jnp.allclose(out, ref_bf16tab, atol=1e-5, rtol=1e-5), \
            f"config {idx}: kernel != bf16-table reference"
        assert jnp.allclose(out, ref_f32, atol=2e-2, rtol=2e-2), \
            f"config {idx}: kernel deviates from f32 reference beyond bf16 rounding"

        if idx == 0:
            # Exercise the bf16-output (writeback-halving) path once.
            out_bf16 = decoder_forward(y, emb_table, conv_w_kd, context_size=K,
                                       out_dtype=jnp.bfloat16, **kwargs)
            out_bf16 = jax.block_until_ready(out_bf16)
            assert out_bf16.dtype == jnp.bfloat16
            assert jnp.allclose(out_bf16.astype(jnp.float32), ref_bf16tab,
                                atol=1e-2, rtol=1e-2), "bf16 output path mismatch"

    print("KERNEL_OK")
</pallas_src>

<mosaic_0001>
module attributes {stable_mosaic.version = 11 : i64} {
  func.func @_decoder_kernel(%arg0: i32, %arg1: memref<2x16xi32, #tpu.memory_space<vmem>>, %arg2: memref<128x128xbf16, #tpu.memory_space<vmem>>, %arg3: memref<2x128xf32, #tpu.memory_space<vmem>>, %arg4: memref<2x8x128xf32, #tpu.memory_space<vmem>>, %arg5: memref<2x16x128xf32, #tpu.memory_space<vmem>>) attributes {dimension_semantics = [#tpu.dimension_semantics<parallel>], iteration_bounds = array<i64: 1>, scalar_prefetch = 0 : i64, scratch_operands = 1 : i64, tpu.core_type = #tpu.core_type<tc>, window_params = [{transform_indices = @transform_0, window_bounds = array<i64: 2, 16>}, {pipeline_mode = #tpu.pipeline_mode<synchronous>, transform_indices = @transform_1, window_bounds = array<i64: 128, 128>}, {pipeline_mode = #tpu.pipeline_mode<synchronous>, transform_indices = @transform_2, window_bounds = array<i64: 2, 128>}, {transform_indices = @transform_3, window_bounds = array<i64: 2, 8, 128>}]} {
    %0 = tpu.iota {dimensions = array<i32: 2>} : vector<1x1x128xi32>
    %c0_i32 = arith.constant 0 : i32
    %c2_i32 = arith.constant 2 : i32
    %1 = arith.muli %c0_i32, %c2_i32 : i32
    %2 = tpu.assume_multiple %1, 2 : i32
    %3 = arith.index_cast %2 : i32 to index
    %c0 = arith.constant 0 : index
    %4 = vector.load %arg1[%3, %c0] : memref<2x16xi32, #tpu.memory_space<vmem>>, vector<2x16xi32>
    %5 = vector.shape_cast %4 : vector<2x16xi32> to vector<2x16x1xi32>
    %6 = vector.broadcast %5 : vector<2x16x1xi32> to vector<2x16x128xi32>
    %7 = vector.broadcast %0 : vector<1x1x128xi32> to vector<2x16x128xi32>
    %8 = arith.cmpi eq, %6, %7 : vector<2x16x128xi32>
    %9 = arith.extui %8 : vector<2x16x128xi1> to vector<2x16x128xi32>
    %10 = arith.sitofp %9 : vector<2x16x128xi32> to vector<2x16x128xf32>
    %11 = arith.truncf %10 : vector<2x16x128xf32> to vector<2x16x128xbf16>
    %12 = vector.shape_cast %11 : vector<2x16x128xbf16> to vector<32x128xbf16>
    %c0_0 = arith.constant 0 : index
    %c0_1 = arith.constant 0 : index
    %13 = vector.load %arg2[%c0_0, %c0_1] : memref<128x128xbf16, #tpu.memory_space<vmem>>, vector<128x128xbf16>
    %cst = arith.constant dense<0.000000e+00> : vector<32x128xf32>
    %14 = tpu.matmul %12, %13, %cst {dimension_numbers = #tpu.dot_dimension_numbers<[1], [0], [0], [1], [0, 0, 1, 1], [], []>} : vector<32x128xbf16>, vector<128x128xbf16>, vector<32x128xf32> -> vector<32x128xf32>
    %15 = vector.shape_cast %14 : vector<32x128xf32> to vector<2x16x128xf32>
    %16 = arith.index_cast %2 : i32 to index
    %c0_2 = arith.constant 0 : index
    %c0_3 = arith.constant 0 : index
    %17 = vector.load %arg5[%16, %c0_2, %c0_3] : memref<2x16x128xf32, #tpu.memory_space<vmem>>, vector<2x16x128xf32>
    tpu.vector_store %arg5[%16, %c0_2, %c0_3], %15 {strides = array<i32>} : memref<2x16x128xf32, #tpu.memory_space<vmem>>, vector<2x16x128xf32>,
    %c1_i32 = arith.constant 1 : i32
    %c0_4 = arith.constant 0 : index
    %c0_5 = arith.constant 0 : index
    %18 = vector.load %arg3[%c0_4, %c0_5] : memref<2x128xf32, #tpu.memory_space<vmem>>, vector<2x128xf32>
    %c0_6 = arith.constant 0 : index
    %c0_7 = arith.constant 0 : index
    %c0_8 = arith.constant 0 : index
    %19 = vector.load %arg5[%c0_6, %c0_7, %c0_8] : memref<2x16x128xf32, #tpu.memory_space<vmem>>, vector<2x8x128xf32>
    %20 = vector.extract_strided_slice %18 {offsets = [0, 0], sizes = [1, 128], strides = [1, 1]} : vector<2x128xf32> to vector<1x128xf32>
    %21 = vector.shape_cast %20 : vector<1x128xf32> to vector<128xf32>
    %22 = vector.shape_cast %21 : vector<128xf32> to vector<1x1x128xf32>
    %23 = vector.broadcast %22 : vector<1x1x128xf32> to vector<2x8x128xf32>
    %24 = arith.mulf %19, %23 : vector<2x8x128xf32>
    %c0_9 = arith.constant 0 : index
    %c1 = arith.constant 1 : index
    %c0_10 = arith.constant 0 : index
    %25 = vector.load %arg5[%c0_9, %c1, %c0_10] : memref<2x16x128xf32, #tpu.memory_space<vmem>>, vector<2x8x128xf32>
    %26 = vector.extract_strided_slice %18 {offsets = [1, 0], sizes = [1, 128], strides = [1, 1]} : vector<2x128xf32> to vector<1x128xf32>
    %27 = vector.shape_cast %26 : vector<1x128xf32> to vector<128xf32>
    %28 = vector.shape_cast %27 : vector<128xf32> to vector<1x1x128xf32>
    %29 = vector.broadcast %28 : vector<1x1x128xf32> to vector<2x8x128xf32>
    %30 = arith.mulf %25, %29 : vector<2x8x128xf32>
    %31 = arith.addf %24, %30 : vector<2x8x128xf32>
    %cst_11 = arith.constant 0.000000e+00 : f32
    %32 = vector.broadcast %cst_11 : f32 to vector<2x8x128xf32>
    %33 = arith.maximumf %31, %32 : vector<2x8x128xf32>
    %c0_12 = arith.constant 0 : index
    %c0_13 = arith.constant 0 : index
    %c0_14 = arith.constant 0 : index
    %34 = vector.load %arg4[%c0_12, %c0_13, %c0_14] : memref<2x8x128xf32, #tpu.memory_space<vmem>>, vector<2x8x128xf32>
    tpu.vector_store %arg4[%c0_12, %c0_13, %c0_14], %33 {strides = array<i32>} : memref<2x8x128xf32, #tpu.memory_space<vmem>>, vector<2x8x128xf32>,
    return
  }
  func.func @transform_0(%arg0: i32) -> (i32, i32) {
    %c0_i32 = arith.constant 0 : i32
    %c0_i32_0 = arith.constant 0 : i32
    return %arg0, %c0_i32 : i32, i32
  }
  func.func @transform_1(%arg0: i32) -> (i32, i32) {
    %c0_i32 = arith.constant 0 : i32
    %c0_i32_0 = arith.constant 0 : i32
    %c0_i32_1 = arith.constant 0 : i32
    return %c0_i32, %c0_i32_0 : i32, i32
  }
  func.func @transform_2(%arg0: i32) -> (i32, i32) {
    %c0_i32 = arith.constant 0 : i32
    %c0_i32_0 = arith.constant 0 : i32
    %c0_i32_1 = arith.constant 0 : i32
    return %c0_i32, %c0_i32_0 : i32, i32
  }
  func.func @transform_3(%arg0: i32) -> (i32, i32, i32) {
    %c0_i32 = arith.constant 0 : i32
    %c0_i32_0 = arith.constant 0 : i32
    %c0_i32_1 = arith.constant 0 : i32
    return %arg0, %c0_i32, %c0_i32_0 : i32, i32, i32
  }
}

</mosaic_0001>

<bundles_post_ra>
// kernel: tpu_custom_call.1
= control target key start
LH: loop header
LB: loop body
LE: loop exit
PB: predicated region body
PF: predicated region fallthrough
CT: control target
= control target key end

     0   :  { %8 = vsyncpa [#allocation4], 0  ;;  %s449_s0 = inlined_call_operand.hbm [shape: s32[2,16], index: 0, kind: input, shape index: {}]   ;;  %s450_s1 = inlined_call_operand.hbm [shape: bf16[128,128], index: 1, kind: input, shape index: {}]   ;;  %s451_s2 = inlined_call_operand.vmem [shape: f32[2,128], index: 2, kind: input, shape index: {}]   ;;  %s452_s3 = inlined_call_operand.hbm [shape: f32[2,8,128], index: 3, kind: output, shape index: {}]  }
   0x1   :  { %9 = vsyncpa [#allocation7], 0 }
   0x2   :  { %10 = vsyncpa [#allocation5], 0  ;;  %s375_s12 = smov [#allocation3]   ;;  %s376_s14 = smov [#allocation6]  }
   0x3   :  { %s17_s13 = sshll.u32 %s375_s12, 4  ;;  %s26_s15 = sshll.u32 %s376_s14, 4  ;;  %s18_s13 = int_to_ptr.vmem [resolvable:$true] %s17_s13  ;;  %s403_s15 = int_to_ptr.vmem [resolvable:$true] %s26_s15 }
   0x4   :  { %s303_s18 = scalar_lea.hbm %s449_s0, 32 }
   0x5   :  { %p304_p0 = scmp.ne.s32.totalorder %s449_s0, %s303_s18  ;;  %p307_p1 = scmp.lt.u32.totalorder %s303_s18, %s449_s0 }
   0x7   :  { %p309_p2 = pnand %p307_p1, %p304_p0 }
   0x9   :  { %312 = shalt.err (!%p309_p2)
}
   0xa   :  { %s313_s23 = scalar_lea.vmem %s18_s13, 32  ;;  %p318_p4 = scmp.lt.s32.totalorder %s18_s13, %s18_s13 }
   0xb   :  { %p314_p3 = scmp.ne.s32.totalorder %s18_s13, %s313_s23  ;;  %p319_p5 = scmp.lt.s32.totalorder %s313_s23, %s313_s23 }
   0xd   :  { %p320_p6 = por %p319_p5, %p318_p4 }
   0xf   :  { %p321_p7 = pnand %p320_p6, %p314_p3 }
  0x11   :  { %324 = shalt.err (!%p321_p7)
}
  0x12   :  { %20 = dma.hbm_to_vmem [thread:$0]  %s449_s0, 32, %s18_s13, [#allocation4]  }
  0x13   :  { %s325_s28 = scalar_lea.hbm %s450_s1, 1024 }
  0x14   :  { %p326_p8 = scmp.ne.s32.totalorder %s450_s1, %s325_s28  ;;  %p329_p9 = scmp.lt.u32.totalorder %s325_s28, %s450_s1 }
  0x16   :  { %p331_p10 = pnand %p329_p9, %p326_p8 }
  0x18   :  { %334 = shalt.err (!%p331_p10)
}
  0x19   :  { %s335_s6 = scalar_lea.vmem %s403_s15, 1024  ;;  %p340_p12 = scmp.lt.s32.totalorder %s403_s15, %s403_s15 }
  0x1a   :  { %p336_p11 = scmp.ne.s32.totalorder %s403_s15, %s335_s6  ;;  %p341_p13 = scmp.lt.s32.totalorder %s335_s6, %s335_s6 }
  0x1c   :  { %p342_p0 = por %p341_p13, %p340_p12 }
  0x1e   :  { %p343_p1 = pnand %p342_p0, %p336_p11 }
  0x20   :  { %346 = shalt.err (!%p343_p1)
}
  0x21   :  { %s377_s0 = smov 64   ;;  %s378_s7 = smov 4  }
  0x22   :  { %32 = dma.hbm_to_vmem [thread:$0]  %s450_s1, 1024, %s403_s15, [#allocation7], %s377_s0, %s377_s0, %s378_s7  }
  0x23   :  { %369 = dma.done.wait [#allocation4], 32  }
  0x24   :  { %370 = vsyncadd [#allocation4], 4294967264 }
  0x25   :  { %371 = dma.done.wait [#allocation7], 1024  }
  0x26   :  { %372 = vsyncadd [#allocation7], 4294966272  ;;  %v42_v0 = vlaneseq  ;;  %v44_v4 = vld [vmem:[#allocation3] sm:$0x3]  ;;  %v295_v7 = vld [vmem:[#allocation6] sm:$0xff]   ;;  %s380_s11 = smov [#allocation8]  }
  0x27   :  { %v296_v8 = vld [vmem:[#allocation6 + $0x8] sm:$0xff]   ;;  %267 = vmatprep.subr.bf16.mxu0 %v295_v7  ;;  %v297_v9 = vld [vmem:[#allocation6 + $0x10] sm:$0xff]   ;;  %v298_v10 = vld [vmem:[#allocation6 + $0x18] sm:$0xff]   ;;  %v379_v20 = vmov 1.0|1.0   ;;  %s228_s12 = sshll.u32 %s380_s11, 4  ;;  %s229_s12 = int_to_ptr.vmem [resolvable:$true] %s228_s12 }
  0x28   :  { %v46_v1 = vshrl.u32 %v42_v0, 7  ;;  %268 = vmatpush3.bf16.msra.mxu0 %v295_v7  ;;  %v299_v11 = vld [vmem:[#allocation6 + $0x20] sm:$0xff]   ;;  %v300_v12 = vld [vmem:[#allocation6 + $0x28] sm:$0xff]   ;;  %v301_v13 = vld [vmem:[#allocation6 + $0x30] sm:$0xff]   ;;  %v43_v17 = vand.u32 127, %v42_v0  ;;  %p352_p3 = scmp.lt.s32.totalorder %s229_s12, %s229_s12 }
  0x29   :  { %269 = vmatprep.subr.bf16.mxu0 %v296_v8  ;;  %v302_v14 = vld [vmem:[#allocation6 + $0x38] sm:$0xff]  }
  0x2a   :  { %v58_v2 = vsub.s32 1, %v46_v1  ;;  %v47_v3 = vsub.s32 0, %v46_v1  ;;  %v200_v21 = vld [vmem:[%s451_s2] sm:$0x3]  ;;  %s347_s2 = scalar_lea.vmem %s229_s12, 256 }
  0x2b   :  { %p348_p2 = scmp.ne.s32.totalorder %s229_s12, %s347_s2  ;;  %p353_p4 = scmp.lt.s32.totalorder %s347_s2, %s347_s2 }
  0x2c   :  { %v59_v5 = vrot.slane %v44_v4, %v58_v2  ;;  %v48_v6 = vrot.slane %v44_v4, %v47_v3  ;;  %270 = vmatpush3.bf16.msra.mxu0 %v296_v8  ;;  %v206_v22 = vrot.slane %v200_v21, %v47_v3  ;;  %v214_v29 = vrot.slane %v200_v21, %v58_v2 }
  0x2d   :  { %271 = vmatprep.subr.bf16.mxu0 %v297_v9  ;;  %p354_p5 = por %p353_p4, %p352_p3 }
  0x2e   :  { %61 = vbcast.lane.b32.xlu1 %v59_v5, 256  ;;  %50 = vbcast.lane.b32.xlu0 %v48_v6, 256 }
  0x2f   :  { %p355_p6 = pnand %p354_p5, %p348_p2 }
  0x30   :  { %272 = vmatpush3.bf16.msra.mxu0 %v297_v9 }
  0x31   :  { %273 = vmatprep.subr.bf16.mxu0 %v298_v10 }
  0x32   :  { %65 = vbcast.lane.b32.xlu1 %v59_v5, 264  ;;  %54 = vbcast.lane.b32.xlu0 %v48_v6, 264 }
  0x34   :  { %274 = vmatpush3.bf16.msra.mxu0 %v298_v10 }
  0x35   :  { %275 = vmatprep.subr.bf16.mxu0 %v299_v11 }
  0x38   :  { %276 = vmatpush3.bf16.msra.mxu0 %v299_v11 }
  0x39   :  { %277 = vmatprep.subr.bf16.mxu0 %v300_v12 }
  0x3c   :  { %278 = vmatpush3.bf16.msra.mxu0 %v300_v12 }
  0x3d   :  { %279 = vmatprep.subr.bf16.mxu0 %v301_v13 }
  0x40   :  { %280 = vmatpush3.bf16.msra.mxu0 %v301_v13 }
  0x41   :  { %281 = vmatprep.subr.bf16.mxu0 %v302_v14 }
  0x44   :  { %282 = vmatpush3.bf16.msra.mxu0 %v302_v14 }
  0xa0   :  { %v62_v15 = vpop.permute.xlu1 %61  ;;  %v51_v16 = vpop.permute.xlu0 %50 }
  0xa1   :  { %vm69_vm0 = vcmp.eq.s32.totalorder %v62_v15, %v43_v17  ;;  %vm67_vm3 = vcmp.eq.s32.totalorder %v51_v16, %v43_v17 }
  0xa4   :  { %v66_v18 = vpop.permute.xlu1 %65  ;;  %v55_v19 = vpop.permute.xlu0 %54 }
  0xa5   :  { %vm70_vm1 = vcmp.eq.s32.totalorder %v66_v18, %v43_v17  ;;  %vm68_vm2 = vcmp.eq.s32.totalorder %v55_v19, %v43_v17 }
  0xa6   :  { %vm255_vm4 = vmpackc.low %vm70_vm1, %vm69_vm0 }
  0xa7   :  { %vm253_vm5 = vmpackc.low %vm68_vm2, %vm67_vm3 }
  0xa8   :  { %283 = vmatprep.mubr.msk.bf16.mxu0 %vm253_vm5, %v379_v20 }
  0xa9   :  { %284 = vmatmul.mubr.msk.bf16.vlgmr.msra.gmra.mrb[0].mxu0 %vm255_vm4, %v379_v20 }
 0x17c   :  { %v285_v23 = vpop.f32.mrb[0].mxu0 }
 0x17d   :  { %198 = vst [vmem:[#allocation2 + $0x10] sm:$0xff] %v285_v23  ;;  %v179_v24 = vpop.f32.mrb[1].mxu0  ;;  %v208_v25 = vmul.f32 %v285_v23, %v206_v22 }
 0x17e   :  { %196 = vst [vmem:[#allocation2] sm:$0xff] %v179_v24  ;;  %v286_v26 = vpop.f32.mrb[2].mxu0  ;;  %v207_v27 = vmul.f32 %v206_v22, %v179_v24 }
 0x17f   :  { %199 = vst [vmem:[#allocation2 + $0x18] sm:$0xff] %v286_v26  ;;  %v182_v28 = vpop.f32.mrb[3].mxu0 }
 0x180   :  { %197 = vst [vmem:[#allocation2 + $0x8] sm:$0xff] %v182_v28 }
 0x186   :  { %v210_v30 = vld [vmem:[#allocation2 + $0x11] sm:$0xff] }
 0x187   :  { %v209_v31 = vld [vmem:[#allocation2 + $0x1] sm:$0xff]  ;;  %v216_v32 = vmul.f32 %v214_v29, %v210_v30 }
 0x188   :  { %v215_v33 = vmul.f32 %v214_v29, %v209_v31 }
 0x189   :  { %v218_v34 = vadd.f32 %v216_v32, %v208_v25 }
 0x18a   :  { %v217_v35 = vadd.f32 %v215_v33, %v207_v27 }
 0x18b   :  { %v220_v36 = vmax.f32 %v218_v34, 0.0 }
 0x18c   :  { %v219_v37 = vmax.f32 %v217_v35, 0.0 }
 0x18d   :  { %222 = vst [vmem:[#allocation8 + $0x8] sm:$0xff] %v220_v36 }
 0x18e   :  { %221 = vst [vmem:[#allocation8] sm:$0xff] %v219_v37 }
 0x18f   :  { %358 = shalt.err (!%p355_p6)
}
 0x190   :  { %s359_s15 = scalar_lea.hbm %s452_s3, 256 }
 0x191   :  { %p360_p7 = scmp.ne.s32.totalorder %s452_s3, %s359_s15  ;;  %p363_p8 = scmp.lt.u32.totalorder %s359_s15, %s452_s3 }
 0x193   :  { %p365_p9 = pnand %p363_p8, %p360_p7 }
 0x195   :  { %368 = shalt.err (!%p365_p9)
}
 0x196   :  { %s381_s20 = smov 128   ;;  %s382_s21 = smov 8  }
 0x197   :  { %234 = dma.vmem_to_hbm [thread:$0]  %s229_s12, 256, %s452_s3, [#allocation5], %s381_s20, %s381_s20, %s382_s21  }
 0x198   :  { %373 = dma.done.wait [#allocation5], 256  }
 0x199   :  { %374 = vsyncadd [#allocation5], 4294967040 }
 0x19a   :  { %238 = vsyncpa [#allocation4], 1 }
 0x19b   :  { %239 = vsyncpa [#allocation7], 1 }
 0x19c   :  { %240 = vsyncpa [#allocation5], 1 }

</bundles_post_ra>
